<compile_context>
chip_gen: v6e
topology: v6e:2x2x1
jax: 0.10.0
libtpu: 0.0.40
codegen_flags: <defaults>
</compile_context>

<pallas_src>
import functools

import jax
import jax.numpy as jnp
from jax.experimental import pallas as pl
from jax.experimental.pallas import tpu as pltpu


def _ensemble_kernel(x_ref, w_ref, b_ref, o_ref, w_acc_ref, *, inv_m):
    d = pl.program_id(1)          # D-tile index (reduction)
    m = pl.program_id(2)          # ensemble-member index (reduction, innermost)
    n_d = pl.num_programs(1)
    n_m = pl.num_programs(2)

    # Zero the resident output block at the start of each batch tile.
    @pl.when((d == 0) & (m == 0))
    def _():
        o_ref[...] = jnp.zeros_like(o_ref)

    # Reset the per-D-tile weight-sum accumulator.
    @pl.when(m == 0)
    def _():
        w_acc_ref[...] = jnp.zeros_like(w_acc_ref)

    # Sum ensemble weights for this D tile (VPU adds only; no MXU work yet).
    w_acc_ref[...] += w_ref[0].astype(jnp.float32)

    # Once all members are accumulated: one MXU matmul per (batch, D) tile,
    # contracting on the lane-dense D axis, accumulated straight into o_ref.
    @pl.when(m == n_m - 1)
    def _():
        o_ref[...] += jax.lax.dot_general(
            x_ref[...], w_acc_ref[...],
            dimension_numbers=(((1,), (1,)), ((), ())),
            preferred_element_type=jnp.float32,
        )

    # Finalize: add summed biases once, divide by ensemble size.
    @pl.when((m == n_m - 1) & (d == n_d - 1))
    def _():
        b_sum = jnp.sum(b_ref[...].astype(jnp.float32), axis=0, keepdims=True)
        o_ref[...] = (o_ref[...] + b_sum) * inv_m


def ensemble_predictor(x_nchw, weights, biases, alpha=0.0, *, d_tile=512):
    """x_nchw: (B, C, H, W); weights: (M, D, num_classes); biases: (M, num_classes)."""
    del alpha  # gradient-reversal coefficient; no effect on forward logits

    B = x_nchw.shape[0]
    D = int(x_nchw.shape[1] * x_nchw.shape[2] * x_nchw.shape[3])
    M, Dw, num_classes = weights.shape
    assert Dw == D, (Dw, D)

    # Glue: flatten NCHW row-major (like torch .view) and make weights
    # lane-dense: (M, num_classes, D) so D (multiple of 128) is the last dim.
    x_flat = x_nchw.reshape(B, D).astype(jnp.float32)
    w_t = jnp.transpose(weights, (0, 2, 1)).astype(jnp.float32)   # (M, C, D)
    b = biases.astype(jnp.float32)                                # (M, C)

    # D tiling (bounded VMEM); fall back to the whole D if it does not divide.
    tk = d_tile if (D >= d_tile and D % d_tile == 0) else D
    # Batch tiling: full batch if it is not sublane-aligned, else modest tiles
    # so the outer "parallel" axis can be split across TensorCores (v7x).
    tb = min(B, 256) if B % 8 == 0 else B

    grid = (B // tb, D // tk, M)
    inv_m = 1.0 / float(M)

    kernel = functools.partial(_ensemble_kernel, inv_m=inv_m)

    return pl.pallas_call(
        kernel,
        out_shape=jax.ShapeDtypeStruct((B, num_classes), jnp.float32),
        grid_spec=pltpu.PrefetchScalarGridSpec(
            num_scalar_prefetch=0,
            grid=grid,
            in_specs=[
                # x tile: (tb, tk), indexed by (batch-tile, D-tile)
                pl.BlockSpec((tb, tk), lambda bi, d, m: (bi, d)),
                # W_m tile: (1, C, tk) — lane-dense D on the last axis
                pl.BlockSpec((1, num_classes, tk), lambda bi, d, m: (m, 0, d)),
                # full bias table, resident (tiny)
                pl.BlockSpec((M, num_classes), lambda bi, d, m: (0, 0)),
            ],
            out_specs=pl.BlockSpec((tb, num_classes), lambda bi, d, m: (bi, 0)),
            scratch_shapes=[pltpu.VMEM((num_classes, tk), jnp.float32)],
        ),
        compiler_params=pltpu.CompilerParams(
            # batch tiles are independent; D-tile and member axes are reductions
            dimension_semantics=("parallel", "arbitrary", "arbitrary"),
            vmem_limit_bytes=32 * 1024 * 1024,
        ),
    )(x_flat, w_t, b)


def reference(x_nchw, weights, biases):
    B = x_nchw.shape[0]
    x_flat = x_nchw.reshape(B, -1).astype(jnp.float32)
    logits = jnp.einsum("bd,mdc->mbc", x_flat, weights.astype(jnp.float32)) \
             + biases.astype(jnp.float32)[:, None, :]
    return logits.mean(axis=0)


if __name__ == "__main__":
    # Small, deterministic problem: batch=2, channels=4, spatial=16x16,
    # num_classes=2, ensemble of 3 members.
    key = jax.random.PRNGKey(0)
    B, C, H, W = 2, 4, 16, 16
    num_classes = 2
    M = 3
    D = C * H * W

    kx, kw, kb = jax.random.split(key, 3)
    x = jax.random.normal(kx, (B, C, H, W), dtype=jnp.float32)
    weights = 0.02 * jax.random.normal(kw, (M, D, num_classes), dtype=jnp.float32)
    biases = 0.1 * jax.random.normal(kb, (M, num_classes), dtype=jnp.float32)

    out = ensemble_predictor(x, weights, biases, alpha=0.0)
    out = jax.block_until_ready(out)

    ref = reference(x, weights, biases)
    assert out.shape == (B, num_classes), out.shape
    assert jnp.allclose(out, ref, atol=1e-4, rtol=1e-4), (out, ref)

    print("KERNEL_OK")
</pallas_src>

<mosaic_0001>
module attributes {stable_mosaic.version = 11 : i64} {
  func.func @_ensemble_kernel(%arg0: i32, %arg1: i32, %arg2: i32, %arg3: memref<2x512xf32, #tpu.memory_space<vmem>>, %arg4: memref<1x2x512xf32, #tpu.memory_space<vmem>>, %arg5: memref<3x2xf32, #tpu.memory_space<vmem>>, %arg6: memref<2x2xf32, #tpu.memory_space<vmem>>, %arg7: memref<2x512xf32, #tpu.memory_space<vmem>>) attributes {dimension_semantics = [#tpu.dimension_semantics<parallel>, #tpu.dimension_semantics<arbitrary>, #tpu.dimension_semantics<arbitrary>], iteration_bounds = array<i64: 1, 2, 3>, scalar_prefetch = 0 : i64, scratch_operands = 1 : i64, tpu.core_type = #tpu.core_type<tc>, window_params = [{transform_indices = @transform_0, window_bounds = array<i64: 2, 512>}, {transform_indices = @transform_1, window_bounds = array<i64: 1, 2, 512>}, {pipeline_mode = #tpu.pipeline_mode<synchronous>, transform_indices = @transform_2, window_bounds = array<i64: 3, 2>}, {transform_indices = @transform_3, window_bounds = array<i64: 2, 2>}]} {
    %c0_i32 = arith.constant 0 : i32
    %0 = arith.cmpi eq, %arg1, %c0_i32 : i32
    %c0_i32_0 = arith.constant 0 : i32
    %1 = arith.cmpi eq, %arg2, %c0_i32_0 : i32
    %2 = arith.andi %0, %1 : i1
    %3 = arith.extui %2 : i1 to i32
    %c0_i32_1 = arith.constant 0 : i32
    %4 = arith.cmpi ne, %3, %c0_i32_1 : i32
    scf.if %4 {
      %cst = arith.constant 0.000000e+00 : f32
      %21 = vector.broadcast %cst : f32 to vector<2x2xf32>
      %c0_13 = arith.constant 0 : index
      %c0_14 = arith.constant 0 : index
      %22 = vector.load %arg6[%c0_13, %c0_14] : memref<2x2xf32, #tpu.memory_space<vmem>>, vector<2x2xf32>
      tpu.vector_store %arg6[%c0_13, %c0_14], %21 {strides = array<i32>} : memref<2x2xf32, #tpu.memory_space<vmem>>, vector<2x2xf32>,
    } else {
    }
    %c0_i32_2 = arith.constant 0 : i32
    %5 = arith.cmpi eq, %arg2, %c0_i32_2 : i32
    %6 = arith.extui %5 : i1 to i32
    %c0_i32_3 = arith.constant 0 : i32
    %7 = arith.cmpi ne, %6, %c0_i32_3 : i32
    scf.if %7 {
      %cst = arith.constant 0.000000e+00 : f32
      %21 = vector.broadcast %cst : f32 to vector<2x512xf32>
      %c0_13 = arith.constant 0 : index
      %c0_14 = arith.constant 0 : index
      %22 = vector.load %arg7[%c0_13, %c0_14] : memref<2x512xf32, #tpu.memory_space<vmem>>, vector<2x512xf32>
      tpu.vector_store %arg7[%c0_13, %c0_14], %21 {strides = array<i32>} : memref<2x512xf32, #tpu.memory_space<vmem>>, vector<2x512xf32>,
    } else {
    }
    %c0 = arith.constant 0 : index
    %c0_4 = arith.constant 0 : index
    %8 = vector.load %arg7[%c0, %c0_4] : memref<2x512xf32, #tpu.memory_space<vmem>>, vector<2x512xf32>
    %c0_5 = arith.constant 0 : index
    %c0_6 = arith.constant 0 : index
    %c0_7 = arith.constant 0 : index
    %9 = vector.load %arg4[%c0_5, %c0_6, %c0_7] : memref<1x2x512xf32, #tpu.memory_space<vmem>>, vector<1x2x512xf32>
    %10 = vector.shape_cast %9 : vector<1x2x512xf32> to vector<2x512xf32>
    %11 = arith.addf %8, %10 : vector<2x512xf32>
    %c0_8 = arith.constant 0 : index
    %c0_9 = arith.constant 0 : index
    %12 = vector.load %arg7[%c0_8, %c0_9] : memref<2x512xf32, #tpu.memory_space<vmem>>, vector<2x512xf32>
    tpu.vector_store %arg7[%c0_8, %c0_9], %11 {strides = array<i32>} : memref<2x512xf32, #tpu.memory_space<vmem>>, vector<2x512xf32>,
    %c2_i32 = arith.constant 2 : i32
    %13 = arith.cmpi eq, %arg2, %c2_i32 : i32
    %14 = arith.extui %13 : i1 to i32
    %c0_i32_10 = arith.constant 0 : i32
    %15 = arith.cmpi ne, %14, %c0_i32_10 : i32
    scf.if %15 {
      %c0_13 = arith.constant 0 : index
      %c0_14 = arith.constant 0 : index
      %21 = vector.load %arg6[%c0_13, %c0_14] : memref<2x2xf32, #tpu.memory_space<vmem>>, vector<2x2xf32>
      %c0_15 = arith.constant 0 : index
      %c0_16 = arith.constant 0 : index
      %22 = vector.load %arg3[%c0_15, %c0_16] : memref<2x512xf32, #tpu.memory_space<vmem>>, vector<2x512xf32>
      %c0_17 = arith.constant 0 : index
      %c0_18 = arith.constant 0 : index
      %23 = vector.load %arg7[%c0_17, %c0_18] : memref<2x512xf32, #tpu.memory_space<vmem>>, vector<2x512xf32>
      %cst = arith.constant dense<0.000000e+00> : vector<2x2xf32>
      %24 = tpu.matmul %22, %23, %cst {dimension_numbers = #tpu.dot_dimension_numbers<[1], [1], [0], [0], [0, 0, 1, 0], [], []>} : vector<2x512xf32>, vector<2x512xf32>, vector<2x2xf32> -> vector<2x2xf32>
      %25 = arith.addf %21, %24 : vector<2x2xf32>
      %c0_19 = arith.constant 0 : index
      %c0_20 = arith.constant 0 : index
      %26 = vector.load %arg6[%c0_19, %c0_20] : memref<2x2xf32, #tpu.memory_space<vmem>>, vector<2x2xf32>
      tpu.vector_store %arg6[%c0_19, %c0_20], %25 {strides = array<i32>} : memref<2x2xf32, #tpu.memory_space<vmem>>, vector<2x2xf32>,
    } else {
    }
    %c2_i32_11 = arith.constant 2 : i32
    %16 = arith.cmpi eq, %arg2, %c2_i32_11 : i32
    %c1_i32 = arith.constant 1 : i32
    %17 = arith.cmpi eq, %arg1, %c1_i32 : i32
    %18 = arith.andi %16, %17 : i1
    %19 = arith.extui %18 : i1 to i32
    %c0_i32_12 = arith.constant 0 : i32
    %20 = arith.cmpi ne, %19, %c0_i32_12 : i32
    scf.if %20 {
      %c0_13 = arith.constant 0 : index
      %c0_14 = arith.constant 0 : index
      %21 = vector.load %arg5[%c0_13, %c0_14] : memref<3x2xf32, #tpu.memory_space<vmem>>, vector<3x2xf32>
      %cst = arith.constant dense<0.000000e+00> : vector<2xf32>
      %22 = vector.multi_reduction <add>, %21, %cst [0] : vector<3x2xf32> to vector<2xf32>
      %23 = vector.shape_cast %22 : vector<2xf32> to vector<1x2xf32>
      %c0_15 = arith.constant 0 : index
      %c0_16 = arith.constant 0 : index
      %24 = vector.load %arg6[%c0_15, %c0_16] : memref<2x2xf32, #tpu.memory_space<vmem>>, vector<2x2xf32>
      %25 = vector.broadcast %23 : vector<1x2xf32> to vector<2x2xf32>
      %26 = arith.addf %24, %25 : vector<2x2xf32>
      %cst_17 = arith.constant 0.333333343 : f32
      %27 = vector.broadcast %cst_17 : f32 to vector<2x2xf32>
      %28 = arith.mulf %26, %27 : vector<2x2xf32>
      %c0_18 = arith.constant 0 : index
      %c0_19 = arith.constant 0 : index
      %29 = vector.load %arg6[%c0_18, %c0_19] : memref<2x2xf32, #tpu.memory_space<vmem>>, vector<2x2xf32>
      tpu.vector_store %arg6[%c0_18, %c0_19], %28 {strides = array<i32>} : memref<2x2xf32, #tpu.memory_space<vmem>>, vector<2x2xf32>,
    } else {
    }
    return
  }
  func.func @transform_0(%arg0: i32, %arg1: i32, %arg2: i32) -> (i32, i32) {
    %c0_i32 = arith.constant 0 : i32
    return %arg0, %arg1 : i32, i32
  }
  func.func @transform_1(%arg0: i32, %arg1: i32, %arg2: i32) -> (i32, i32, i32) {
    %c0_i32 = arith.constant 0 : i32
    %c0_i32_0 = arith.constant 0 : i32
    return %arg2, %c0_i32, %arg1 : i32, i32, i32
  }
  func.func @transform_2(%arg0: i32, %arg1: i32, %arg2: i32) -> (i32, i32) {
    %c0_i32 = arith.constant 0 : i32
    %c0_i32_0 = arith.constant 0 : i32
    %c0_i32_1 = arith.constant 0 : i32
    return %c0_i32, %c0_i32_0 : i32, i32
  }
  func.func @transform_3(%arg0: i32, %arg1: i32, %arg2: i32) -> (i32, i32) {
    %c0_i32 = arith.constant 0 : i32
    %c0_i32_0 = arith.constant 0 : i32
    return %arg0, %c0_i32 : i32, i32
  }
}

</mosaic_0001>

<bundles_post_ra>
// kernel: tpu_custom_call.1
= control target key start
LH: loop header
LB: loop body
LE: loop exit
PB: predicated region body
PF: predicated region fallthrough
CT: control target
= control target key end

     0   :  { %s1150_s0 = inlined_call_operand.hbm [shape: f32[2,1024], index: 0, kind: input, shape index: {}]   ;;  %s1151_s1 = inlined_call_operand.hbm [shape: f32[3,2,1024], index: 1, kind: input, shape index: {}]   ;;  %s1152_s2 = inlined_call_operand.vmem [shape: f32[3,2], index: 2, kind: input, shape index: {}]   ;;  %s1153_s3 = inlined_call_operand.hbm [shape: f32[2,2], index: 3, kind: output, shape index: {}]  }
   0x1   :  { %1159 = sst [smem:[#allocation16_spill]] %s1150_s0 }
   0x2   :  { %1160 = sst [smem:[#allocation17_spill]] %s1152_s2 }
   0x3   :  { %1161 = sst [smem:[#allocation18_spill]] %s1153_s3 }
   0x4   :  { %8 = vsyncpa [#allocation4], 0 }
   0x5   :  { %10 = vsyncpa [#allocation4 + $0x1], 0 }
   0x6   :  { %11 = vsyncpa [#allocation7], 0 }
   0x7   :  { %13 = vsyncpa [#allocation7 + $0x1], 0 }
   0x8   :  { %14 = vsyncpa [#allocation5], 0  ;;  %s919_s12 = smov 0   ;;  %s921_s13 = smov 0  }
   0x9   :  { %s923_s14 = smov 0   ;;  %s925_s15 = smov 0  }
   0xa   :  { %s927_s16 = smov 0   ;;  %s929_s17 = smov 0  }
   0xb   :  { %s931_s18 = smov 0   ;;  %s933_s19 = smov 0  }
   0xc   :  { %s935_s20 = smov 0   ;;  %s937_s21 = smov 0  }
   0xd   :  { %s939_s22 = smov 0  }
   0xe LB: > { %1162 = sst [smem:[#allocation12_spill]] %s875_s18  ;;  %s1155_s23 = sadd.s32 4294967295, %s891_s22   ;;  %s891_s22 = sphi %s939_s22, %s20_s22   ;;  %s887_s21 = sphi %s937_s21, %s1196_s21   ;;  %s883_s20 = sphi %s935_s20, %s1195_s20   ;;  %s879_s19 = sphi %s933_s19, %s1194_s19   ;;  %s875_s18 = sphi %s931_s18, %s1193_s18   ;;  %s871_s17 = sphi %s929_s17, %s1192_s17   ;;  %s867_s16 = sphi %s927_s16, %s1191_s16   ;;  %s863_s15 = sphi %s925_s15, %s1190_s15   ;;  %s859_s14 = sphi %s923_s14, %s1189_s14   ;;  %s855_s13 = sphi %s921_s13, %s1188_s13   ;;  %s851_s12 = sphi %s919_s12, %s1187_s12  }
   0xf   : > { %1163 = sst [smem:[#allocation13_spill]] %s879_s19  ;;  %s35_s24 = sadd.s32 1, %s887_s21 }
  0x10   : > { %p55_p0 = scmp.ne.s32.totalorder %s871_s17, %s867_s16  ;;  %p56_p1 = scmp.eq.s32.totalorder %s891_s22, 0 }
  0x11   : > { %p61_p2 = scmp.ne.s32.totalorder %s867_s16, %s863_s15  ;;  %p980_p3 = scmp.eq.s32.totalorder %s1155_s23, 0 }
  0x12   : > { %p57_p4 = por %p56_p1, %p55_p0  ;;  %p1154_p5 = scmp.lt.s32.totalorder %s891_s22, 6 }
  0x13   : > { %p989_p6 = por %p980_p3, %p61_p2  ;;  %s163_s27 = sand.u32 1, %s871_s17  }
  0x14   : > { %s584_s28 = sshll.u32 %s163_s27, 3  ;;  %s600_s29 = sshll.u32 %s887_s21, 7 }
  0x15   : > { %s1166_s0 = sld [smem:[#allocation16_spill]]  ;;  %s167_s6 = scalar_lea.vmem [#allocation3], %s584_s28 }
  0x16   : > { %s177_s7 = sshll.u32 %s167_s6, 4  ;;  %p1000_p7 = pnand %p1154_p5, %p57_p4  ;;  %s178_s7 = int_to_ptr.vmem [resolvable:$true] %s177_s7 }
  0x17   : > { %p591_p8 = scmp.ge.s32.totalorder %s891_s22, 1  ;;  %p203_p9 = scmp.lt.s32.totalorder %s891_s22, 7 }
  0x18   : > { %s164_s9 = scalar_lea.sflag [#allocation4], %s163_s27  ;;  %p715_p10 = pneg %p1000_p7 }
  0x19   : > { %s726_s10 = scalar_lea.vmem %s178_s7, 128  ;;  %s893_s11 = smov [#allocation3]  }
  0x1a   : > { %p727_p11 = scmp.ne.s32.totalorder %s178_s7, %s726_s10  ;;  %s731_s15 = sshll.u32 %s893_s11, 4  ;;  %s732_s15 = int_to_ptr.vmem [resolvable:$false] %s731_s15 }
  0x1b   : > { %s175_s5 = scalar_lea.hbm %s1166_s0, %s600_s29  ;;  %s733_s28 = scalar_lea.vmem %s732_s15, 256 }
  0x1c   : > { %p729_p12 = pnand %p727_p11, %p715_p10  ;;  %p734_p0 = scmp.lt.s32.totalorder %s178_s7, %s732_s15 }
  0x1d   : > { %p735_p2 = scmp.lt.s32.totalorder %s733_s28, %s726_s10 }
  0x1e   : > { %p730_p13 = pneg %p729_p12 }
  0x1f   : > { %p736_p4 = por %p735_p2, %p734_p0 }
  0x21   : > { %p737_p5 = pnand %p736_p4, %p730_p13 }
  0x23   : > { %740 = shalt.err (!%p737_p5)
}
  0x24   : > { %612 = dma.hbm_to_vmem [thread:$0]  (!%p1000_p7), %s175_s5, 128, %s178_s7, %s164_s9  }
  0x25   : > { %p1014_p5 = pnand %p591_p8, %p203_p9  ;;  %s48_s29 = sadd.s32 1, %s871_s17 }
  0x26   : > { %s32_s30 = sadd.s32 1, %s883_s20  ;;  %p83_p11 = scmp.ne.s32.totalorder %s859_s14, %s855_s13 }
  0x27   : > { %p33_p10 = scmp.ge.s32.totalorder %s32_s30, 3  ;;  %p89_p12 = scmp.ne.s32.totalorder %s855_s13, %s851_s12 }
  0x28   : > { %s184_s4 = sand.u32 1, %s859_s14   ;;  %s76_s6 = sadd.s32 1, %s859_s14 }
  0x29   : > { %s1198_s30 = smov (%p33_p10, %s32_s30), 0  ;;  %s1200_s24 = smov (!%p33_p10, %s35_s24), %s887_s21 }
  0x2a   : > { %1169 = sst [smem:[#allocation14_spill]] %s1198_s30  ;;  %s71_s5 = ssub.s32 %s883_s20, %s1198_s30 }
  0x2b   : > { %p37_p7 = scmp.ge.s32.totalorder %s1200_s24, 2  ;;  %p1035_p8 = por %p89_p12, %p980_p3 }
  0x2c   : > { %p1041_p9 = por %p83_p11, %p56_p1  ;;  %s587_s12 = sshll.u32 %s184_s4, 3 }
  0x2d   : > { %s1202_s24 = smov (%p37_p7, %s1200_s24), 0  ;;  %s588_s9 = sshll.u32 %s887_s21, 2 }
  0x2e   : > { %1172 = sst [smem:[#allocation15_spill]] %s1202_s24  ;;  %s44_s10 = ssub.s32 %s887_s21, %s1202_s24 }
  0x2f   : > { %s589_s11 = sshll.u32 %s883_s20, 3  ;;  %p46_p13 = scmp.eq.s32.totalorder %s44_s10, 0 }
  0x30   : > { %s73_s25 = sor.u32 %s71_s5, %s44_s10  ;;  %s194_s15 = sadd.s32 %s589_s11, %s588_s9 }
  0x31   : > { %p74_p3 = scmp.eq.s32.totalorder %s73_s25, 0  ;;  %s590_s0 = sshll.u32 %s194_s15, 5 }
  0x32   : > { %s1052_s28 = scalar_select %p46_p13, %s871_s17, %s48_s29  }
  0x33   : > { %s1055_s23 = scalar_select %p74_p3, %s859_s14, %s76_s6  }
  0x34   : > { %s188_s30 = scalar_lea.vmem [#allocation6], %s587_s12  ;;  %s196_s19 = scalar_lea.hbm %s1151_s1, %s590_s0 }
  0x35   : > { %s198_s3 = sshll.u32 %s188_s30, 4  ;;  %p1173_p1 = scmp.lt.s32.totalorder %s891_s22, 6  ;;  %s199_s3 = int_to_ptr.vmem [resolvable:$true] %s198_s3 }
  0x36   : > { %s185_s5 = scalar_lea.sflag [#allocation7], %s184_s4  ;;  %s754_s29 = scalar_lea.vmem %s199_s3, 128 }
  0x37   : > { %p1064_p0 = pnand %p1173_p1, %p1041_p9  ;;  %p755_p4 = scmp.ne.s32.totalorder %s199_s3, %s754_s29 }
  0x38   : > { %s894_s30 = smov [#allocation6]  }
  0x39   : > { %p743_p2 = pneg %p1064_p0  ;;  %s759_s6 = sshll.u32 %s894_s30, 4  ;;  %s760_s6 = int_to_ptr.vmem [resolvable:$false] %s759_s6 }
  0x3a   : > { %s761_s2 = scalar_lea.vmem %s760_s6, 256  ;;  %p762_p12 = scmp.lt.s32.totalorder %s199_s3, %s760_s6 }
  0x3b   : > { %p757_p10 = pnand %p755_p4, %p743_p2  ;;  %p763_p7 = scmp.lt.s32.totalorder %s761_s2, %s754_s29 }
  0x3d   : > { %p758_p11 = pneg %p757_p10  ;;  %p764_p13 = por %p763_p7, %p762_p12 }
  0x3f   : > { %p765_p3 = pnand %p764_p13, %p758_p11 }
  0x41   : > { %768 = shalt.err (!%p765_p3)
}
  0x42   : > { %615 = dma.hbm_to_vmem [thread:$0]  (!%p1064_p0), %s196_s19, 128, %s199_s3, %s185_s5  }
  0x43   : > { %207 = sbr.rel (%p1014_p5) target bundleno = 391 (0x187), region = 32  ;;  %s209_s0 = sand.u32 (!%p1014_p5), 1, %s867_s16  }
  0x44   : > { %s1075_s18 = sshll.u32 (!%p1014_p5), %s209_s0, 3  ;;  %s210_s4 = scalar_lea.sflag (!%p1014_p5), [#allocation4], %s209_s0 }
  0x45   : > { %s213_s8 = scalar_lea.vmem (!%p1014_p5), [#allocation3], %s1075_s18 }
  0x48   : > { %838 = dma.done.wait (%p989_p6), %s210_s4, 128  }
  0x49   : > { %840 = vsyncadd (%p989_p6), %s210_s4, 4294967168  ;;  %s218_s24 = sand.u32 1, %s855_s13  }
  0x4a   : > { %s593_s3 = sshll.u32 %s218_s24, 3  ;;  %s219_s19 = scalar_lea.sflag [#allocation7], %s218_s24 }
  0x4b   : > { %s222_s27 = scalar_lea.vmem [#allocation6], %s593_s3 }
  0x4c   : > { %842 = dma.done.wait (%p1035_p8), %s219_s19, 128  }
  0x4d   : > { %844 = vsyncadd (%p1035_p8), %s219_s19, 4294967168  ;;  %s1175_s12 = sld [smem:[#allocation13_spill]] }
  0x4e   : > { %s1176_s9 = sld [smem:[#allocation12_spill]] }
  0x53   : > { %p247_p5 = scmp.eq.s32.totalorder %s1175_s12, 0 }
  0x54   : > { %p248_p9 = scmp.eq.s32.totalorder %s1176_s9, 0 }
  0x56   : > { %p249_p1 = pnand %p248_p9, %p247_p5 }
  0x58   : > { %252 = sbr.rel (%p249_p1) target bundleno = 95 (0x5f), region = 44 }
  0x5d   : > { %vm253_vm0 = vcmask 9216   ;;  %v895_v0 = vmov 0.0  }
  0x5e   : > { %254 = vst.msk [vmem:[#allocation8] sm:$0x3] %vm253_vm0, %v895_v0 }
  0x5f PF: > { %s1177_s26 = sld [smem:[#allocation12_spill]] }
  0x65   : > { %p594_p6 = scmp.ne.s32.totalorder %s1177_s26, 0 }
  0x67   : > { %257 = sbr.rel (%p594_p6) target bundleno = 110 (0x6e), region = 48 }
  0x6c   : > { %v896_v1 = vmov 0.0  }
  0x6d   : > { %258 = vst [vmem:[#allocation2] sm:$0xff] %v896_v1 }
  0x6e PF: > { %s1178_s10 = sld [smem:[#allocation12_spill]]  ;;  %v260_v3 = vld [vmem:[%s222_s27] sm:$0xff] }
  0x74   : > { %v259_v2 = vld [vmem:[#allocation2] sm:$0xff]  ;;  %p263_p8 = scmp.eq.s32.totalorder %s1178_s10, 2  ;;  %p595_p0 = scmp.ne.s32.totalorder %s1178_s10, 2 }
  0x75   : > { %v261_v4 = vadd.f32 %v260_v3, %v259_v2 }
  0x76   : > { %266 = sbr.rel (%p595_p0) target bundleno = 336 (0x150), region = 52 }
  0x77   : > { %262 = vst [vmem:[#allocation2] sm:$0xff] %v261_v4 }
  0x7b   : > { %v275_v6 = vlaneseq  ;;  %v268_v7 = vld [vmem:[%s213_s8] sm:$0xff]  ;;  %v897_v8 = vmov 1983009808   ;;  %vm455_vm1 = vcmask 9216  }
  0x7c   : > { %v273_v9 = vunpack.c.l.s4 %v897_v8  ;;  %v271_v13 = vcombine.high %v268_v7, %v268_v7  ;;  %v267_v24 = vld [vmem:[#allocation8] sm:$0x3] }
  0x7d   : > { %v276_v10 = vshrl.u32 %v275_v6, 7 }
  0x7e   : > { %v269_v5 = vld [vmem:[#allocation2] sm:$0xff]  ;;  %v274_v11 = vunpack.c.0.s8 %v273_v9 }
  0x7f   : > { %v293_v12 = vcombine.high %v269_v5, %v269_v5 }
  0x80   : > { %v277_v14 = vsub.s32 %v274_v11, %v276_v10 }
  0x82   : > { %v300_v15 = vrot.slane %v269_v5, %v277_v14  ;;  %v307_v16 = vrot.slane %v293_v12, %v277_v14  ;;  %v278_v17 = vrot.slane %v268_v7, %v277_v14  ;;  %v285_v18 = vrot.slane %v271_v13, %v277_v14 }
  0x84   : > { %v308_v19 = vcombine.high %v300_v15, %v300_v15  ;;  %v309_v20 = vcombine.high %v307_v16, %v307_v16  ;;  %v286_v21 = vcombine.high %v278_v17, %v278_v17  ;;  %v287_v22 = vcombine.high %v285_v18, %v285_v18 }
  0x86   : > { %344 = vmatprep.subr.mxu0 %v308_v19  ;;  %414 = vmatprep.subr.mxu1 %v309_v20 }
  0x87   : > { %345 = vmatpush1.xpose.msra.mxu0 %v300_v15  ;;  %415 = vmatpush1.xpose.msra.mxu1 %v307_v16 }
  0x88   : > { %378 = vmatprep.mubr.f32.mxu0 %v286_v21  ;;  %448 = vmatprep.mubr.f32.mxu1 %v287_v22 }
  0x8a   : > { %379 = vmatmul.mubr.f32.vlgmr.msra.gmra.mxu0 %v278_v17  ;;  %449 = vmatmul.mubr.f32.vlgmr.msra.gmra.mxu1 %v285_v18 }
 0x14a   : > { %v380_v23 = vpop.f32.mrf.mxu0  ;;  %v450_v25 = vpop.f32.mrf.mxu1 }
 0x14b   : > { %v451_v26 = vadd.f32 %v450_v25, %v380_v23 }
 0x14c   : > { %v382_v27 = vpop.f32.mrf.mxu0  ;;  %v452_v28 = vpop.f32.mrf.mxu1 }
 0x14d   : > { %v454_v29 = vadd.f32 %v451_v26, %v267_v24 }
 0x14f   : > { %456 = vst.msk [vmem:[#allocation8] sm:$0x3] %vm455_vm1, %v454_v29 }
 0x150 PF: > { %s1179_s7 = sld [smem:[#allocation13_spill]] }
 0x156   : > { %p457_p2 = scmp.eq.s32.totalorder %s1179_s7, 1 }
 0x158   : > { %p458_p4 = pnand %p457_p2, %p263_p8 }
 0x159   : > { %s1181_s5 = sld [smem:[#allocation17_spill]] (!%p458_p4) }
 0x15a   : > { %461 = sbr.rel (%p458_p4) target bundleno = 370 (0x172), region = 56 }
 0x15f   : > { %v462_v30 = vld [vmem:[%s1181_s5] sm:$0x7]  ;;  %vm463_vm2 = vcmask 10240   ;;  %v471_v37 = vld [vmem:[#allocation8] sm:$0x3]  ;;  %vm474_vm3 = vcmask 9216  }
 0x160   : > { %v464_v31 = vsel %vm463_vm2, %v462_v30, 0.0 }
 0x161   : > { %v465_v32 = vrot.slane %v464_v31, 4 }
 0x163   : > { %v466_v33 = vadd.f32 %v465_v32, %v464_v31 }
 0x165   : > { %v467_v34 = vrot.slane %v466_v33, 2 }
 0x167   : > { %v468_v35 = vadd.f32 %v467_v34, %v466_v33 }
 0x169   : > { %v469_v36 = vrot.slane %v468_v35, 1 }
 0x16b   : > { %v470_v38 = vadd.f32 %v469_v36, %v468_v35 }
 0x16d   : > { %v472_v39 = vadd.f32 %v471_v37, %v470_v38 }
 0x16f   : > { %v473_v40 = vmul.f32 0.33333334, %v472_v39 }
 0x171   : > { %475 = vst.msk [vmem:[#allocation8] sm:$0x3] %vm474_vm3, %v473_v40 }
 0x172 PF: > { %s1182_s29 = sadd.s32 4294967295, %s891_s22   ;;  %s898_s6 = smov [#allocation8]  }
 0x173   : > { %p1102_p10 = scmp.eq.s32.totalorder %s1182_s29, 5  ;;  %s485_s2 = sshll.u32 %s898_s6, 4  ;;  %s486_s2 = int_to_ptr.vmem [resolvable:$true] %s485_s2 }
 0x174   : > { %s769_s0 = scalar_lea.vmem %s486_s2, 32  ;;  %p776_p13 = scmp.lt.s32.totalorder %s486_s2, %s486_s2 }
 0x175   : > { %p770_p11 = scmp.ne.s32.totalorder %s486_s2, %s769_s0  ;;  %p777_p3 = scmp.lt.s32.totalorder %s769_s0, %s769_s0 }
 0x177   : > { %p771_p12 = pnand %p770_p11, %p1102_p10  ;;  %p778_p5 = por %p777_p3, %p776_p13 }
 0x179   : > { %p772_p7 = pneg %p771_p12 }
 0x17b   : > { %p779_p9 = pnand %p778_p5, %p772_p7 }
 0x17d   : > { %782 = shalt.err (!%p779_p9)
}
 0x17e   : > { %s1184_s8 = sld [smem:[#allocation18_spill]] }
 0x184   : > { %606 = dma.vmem_to_hbm [thread:$0]  (%p1102_p10), %s486_s2, 32, %s1184_s8, [#allocation5]  }
 0x185   : > { %846 = dma.done.wait (%p1102_p10), [#allocation5], 32  }
 0x186   : > { %848 = vsyncadd (%p1102_p10), [#allocation5], 4294967264 }
 0x187 PF: > { %s20_s22 = sadd.s32 1, %s891_s22   ;;  %s1185_s24 = sld [smem:[#allocation14_spill]] }
 0x188   : > { %p17_p1 = scmp.ge.s32.totalorder %s20_s22, 8   ;;  %s1186_s3 = sld [smem:[#allocation15_spill]] }
 0x189   : > { %s1187_s12 = smov %s855_s13  ;;  %s1188_s13 = smov %s859_s14 }
 0x18a   : > { %s1189_s14 = smov %s1055_s23  ;;  %s1190_s15 = smov %s867_s16 }
 0x18b   : > { %s1191_s16 = smov %s871_s17  ;;  %s1192_s17 = smov %s1052_s28 }
 0x18c   : > { %s1193_s18 = smov %s883_s20  ;;  %s1194_s19 = smov %s887_s21 }
 0x18d   : > { %s1195_s20 = smov %s1185_s24  ;;  %19 = sbr.rel (!%p17_p1) target bundleno = 14 (0xe), region = 99 }
 0x18e   : > { %s1196_s21 = smov %s1186_s3 }
 0x192   :  { %498 = vsyncpa [#allocation4], 1 }
 0x193   :  { %500 = vsyncpa [#allocation4 + $0x1], 1 }
 0x194   :  { %501 = vsyncpa [#allocation7], 1 }
 0x195   :  { %503 = vsyncpa [#allocation7 + $0x1], 1 }
 0x196   :  { %504 = vsyncpa [#allocation5], 1 }
 0x197   :  { %506 = vsyncpa [#allocation5 + $0x1], 1 }

</bundles_post_ra>
